<compile_context>
chip_gen: v6e
topology: v6e:2x2x1
jax: 0.10.0
libtpu: 0.0.40
codegen_flags: <defaults>
</compile_context>

<pallas_src>
import jax
import jax.numpy as jnp
from jax.experimental import pallas as pl
from jax.experimental.pallas import tpu as pltpu


def _round_up(n, m):
    return ((n + m - 1) // m) * m


def _cdiv(a, b):
    return -(-a // b)


def _pad2(a, rows, cols):
    """Zero-pad a 2-D array up to (rows, cols)."""
    return jnp.pad(a, ((0, rows - a.shape[0]), (0, cols - a.shape[1])))


def _mlp_kernel(x_ref, w1_ref, b1_ref, w2_ref, b2_ref, w3_ref, b3_ref,
                o_ref, xp_ref):
    """Fused fc1->relu->fc2->relu->fc3 for one batch tile, all f32."""
    tm, F = x_ref.shape
    C = o_ref.shape[1]

    # Lane-pad the x tile (tm, F) -> (tm, F_pad) inside VMEM so every dot runs
    # on clean 128-lane operands.  Re-zero the scratch every step (a handful of
    # vreg stores, negligible) so it is valid no matter which TensorCore
    # executes which slice of the "parallel" grid.
    xp_ref[...] = jnp.zeros_like(xp_ref)
    xp_ref[:, :F] = x_ref[...]

    # fc1 + relu  (f32 operands, f32 accumulate)
    h1 = jnp.dot(xp_ref[...], w1_ref[...], preferred_element_type=jnp.float32)
    h1 = jnp.maximum(h1 + b1_ref[...], 0.0)
    # fc2 + relu
    h2 = jnp.dot(h1, w2_ref[...], preferred_element_type=jnp.float32)
    h2 = jnp.maximum(h2 + b2_ref[...], 0.0)
    # fc3 (no activation)
    out = jnp.dot(h2, w3_ref[...], preferred_element_type=jnp.float32)
    out = out + b3_ref[...]

    # Store only the logical num_classes columns (block spans the full last dim
    # of the output array, so the HBM writeback is a small contiguous slab).
    o_ref[...] = out[:, :C].astype(o_ref.dtype)


def _batch_tile(B):
    if B <= 1024:
        # Whole (sublane-rounded) batch in a single grid step — per-step
        # overhead dominates at this size.
        return _round_up(B, 8)
    # Large batch: 512-1024 row tiles, and at least 2 tiles so both v7x
    # TensorCores engage on the "parallel" batch axis.
    return min(1024, _round_up(_cdiv(B, 2), 128))


@jax.jit
def hand_gesture_forward(x, params):
    """x: (B, input_size) f32. params: w1,b1,w2,b2,w3,b3 stored as (in, out)."""
    w1, b1, w2, b2, w3, b3 = (params[k] for k in ("w1", "b1", "w2", "b2", "w3", "b3"))

    B, F = x.shape
    H1 = w1.shape[1]          # 128
    H2 = w2.shape[1]          # 64
    C = w3.shape[1]           # num_classes

    # Lane-dense padded dims for the (tiny) weights and the in-kernel operands.
    F_pad = _round_up(F, 128)
    H1_pad = _round_up(H1, 128)
    H2_pad = _round_up(H2, 128)
    C_pad = _round_up(C, 128)

    tm = _batch_tile(B)
    n_tiles = _cdiv(B, tm)    # partial last tile is handled by masked writes

    # Zero-pad weights/biases (math-preserving: zero rows/cols contribute
    # nothing, relu(0)=0).  x and the output are NOT padded or copied in the
    # wrapper — the kernel consumes x directly and writes only (B, C).
    w1_p = _pad2(w1, F_pad, H1_pad)
    b1_p = _pad2(b1, 1, H1_pad)
    w2_p = _pad2(w2, H1_pad, H2_pad)
    b2_p = _pad2(b2, 1, H2_pad)
    w3_p = _pad2(w3, H2_pad, C_pad)
    b3_p = _pad2(b3, 1, C_pad)

    # Weights/biases: constant index_map -> loaded once, resident in VMEM.
    const = lambda shape: pl.BlockSpec(shape, lambda i: (0, 0))

    out = pl.pallas_call(
        _mlp_kernel,
        out_shape=jax.ShapeDtypeStruct((B, C), jnp.float32),
        grid_spec=pltpu.PrefetchScalarGridSpec(
            num_scalar_prefetch=0,
            grid=(n_tiles,),
            in_specs=[
                pl.BlockSpec((tm, F), lambda i: (i, 0)),   # x tile (unpadded)
                const((F_pad, H1_pad)),                    # w1
                const((1, H1_pad)),                        # b1
                const((H1_pad, H2_pad)),                   # w2
                const((1, H2_pad)),                        # b2
                const((H2_pad, C_pad)),                    # w3
                const((1, C_pad)),                         # b3
            ],
            out_specs=pl.BlockSpec((tm, C), lambda i: (i, 0)),
            scratch_shapes=[pltpu.VMEM((tm, F_pad), jnp.float32)],
        ),
        compiler_params=pltpu.CompilerParams(
            dimension_semantics=("parallel",),
        ),
    )(x, w1_p, b1_p, w2_p, b2_p, w3_p, b3_p)

    return out


def init_params(key, input_size, num_classes):
    """Deterministic synthetic parameters (PyTorch Linear shapes, stored transposed)."""
    k1, k2, k3, k4, k5, k6 = jax.random.split(key, 6)
    scale = 0.05
    return {
        "w1": scale * jax.random.normal(k1, (input_size, 128), jnp.float32),
        "b1": scale * jax.random.normal(k2, (1, 128), jnp.float32),
        "w2": scale * jax.random.normal(k3, (128, 64), jnp.float32),
        "b2": scale * jax.random.normal(k4, (1, 64), jnp.float32),
        "w3": scale * jax.random.normal(k5, (64, num_classes), jnp.float32),
        "b3": scale * jax.random.normal(k6, (1, num_classes), jnp.float32),
    }


if __name__ == "__main__":
    key = jax.random.PRNGKey(0)
    kx, kp = jax.random.split(key)

    # Hand-landmark style input: 21 landmarks * 3 coords = 63 features, 8 gestures.
    batch, input_size, num_classes = 8, 63, 8
    x = jax.random.normal(kx, (batch, input_size), jnp.float32)
    params = init_params(kp, input_size, num_classes)

    out = hand_gesture_forward(x, params)
    out = jax.block_until_ready(out)
    assert out.shape == (batch, num_classes)

    # Pure-f32 reference (same math as the PyTorch module).
    h1 = jnp.maximum(x @ params["w1"] + params["b1"], 0.0)
    h2 = jnp.maximum(h1 @ params["w2"] + params["b2"], 0.0)
    ref = h2 @ params["w3"] + params["b3"]

    # Tolerance covers possible MXU multi-pass f32 rounding differences.
    assert jnp.allclose(out, ref, atol=1e-2, rtol=1e-2), float(
        jnp.max(jnp.abs(out - ref)))

    print("KERNEL_OK")
</pallas_src>

<mosaic_0001>
module attributes {stable_mosaic.version = 11 : i64} {
  func.func @_mlp_kernel(%arg0: i32, %arg1: memref<8x63xf32, #tpu.memory_space<vmem>>, %arg2: memref<128x128xf32, #tpu.memory_space<vmem>>, %arg3: memref<1x128xf32, #tpu.memory_space<vmem>>, %arg4: memref<128x128xf32, #tpu.memory_space<vmem>>, %arg5: memref<1x128xf32, #tpu.memory_space<vmem>>, %arg6: memref<128x128xf32, #tpu.memory_space<vmem>>, %arg7: memref<1x128xf32, #tpu.memory_space<vmem>>, %arg8: memref<8x8xf32, #tpu.memory_space<vmem>>, %arg9: memref<8x128xf32, #tpu.memory_space<vmem>>) attributes {dimension_semantics = [#tpu.dimension_semantics<parallel>], iteration_bounds = array<i64: 1>, scalar_prefetch = 0 : i64, scratch_operands = 1 : i64, tpu.core_type = #tpu.core_type<tc>, window_params = [{transform_indices = @transform_0, window_bounds = array<i64: 8, 63>}, {pipeline_mode = #tpu.pipeline_mode<synchronous>, transform_indices = @transform_1, window_bounds = array<i64: 128, 128>}, {pipeline_mode = #tpu.pipeline_mode<synchronous>, transform_indices = @transform_2, window_bounds = array<i64: 1, 128>}, {pipeline_mode = #tpu.pipeline_mode<synchronous>, transform_indices = @transform_3, window_bounds = array<i64: 128, 128>}, {pipeline_mode = #tpu.pipeline_mode<synchronous>, transform_indices = @transform_4, window_bounds = array<i64: 1, 128>}, {pipeline_mode = #tpu.pipeline_mode<synchronous>, transform_indices = @transform_5, window_bounds = array<i64: 128, 128>}, {pipeline_mode = #tpu.pipeline_mode<synchronous>, transform_indices = @transform_6, window_bounds = array<i64: 1, 128>}, {transform_indices = @transform_7, window_bounds = array<i64: 8, 8>}]} {
    %cst = arith.constant 0.000000e+00 : f32
    %0 = vector.broadcast %cst : f32 to vector<8x128xf32>
    %c0 = arith.constant 0 : index
    %c0_0 = arith.constant 0 : index
    %1 = vector.load %arg9[%c0, %c0_0] : memref<8x128xf32, #tpu.memory_space<vmem>>, vector<8x128xf32>
    tpu.vector_store %arg9[%c0, %c0_0], %0 {strides = array<i32>} : memref<8x128xf32, #tpu.memory_space<vmem>>, vector<8x128xf32>,
    %c0_1 = arith.constant 0 : index
    %c0_2 = arith.constant 0 : index
    %2 = vector.load %arg1[%c0_1, %c0_2] : memref<8x63xf32, #tpu.memory_space<vmem>>, vector<8x63xf32>
    %c0_3 = arith.constant 0 : index
    %c0_4 = arith.constant 0 : index
    %3 = vector.load %arg9[%c0_3, %c0_4] : memref<8x128xf32, #tpu.memory_space<vmem>>, vector<8x63xf32>
    tpu.vector_store %arg9[%c0_3, %c0_4], %2 {strides = array<i32>} : memref<8x128xf32, #tpu.memory_space<vmem>>, vector<8x63xf32>,
    %c0_5 = arith.constant 0 : index
    %c0_6 = arith.constant 0 : index
    %4 = vector.load %arg9[%c0_5, %c0_6] : memref<8x128xf32, #tpu.memory_space<vmem>>, vector<8x128xf32>
    %c0_7 = arith.constant 0 : index
    %c0_8 = arith.constant 0 : index
    %5 = vector.load %arg2[%c0_7, %c0_8] : memref<128x128xf32, #tpu.memory_space<vmem>>, vector<128x128xf32>
    %cst_9 = arith.constant dense<0.000000e+00> : vector<8x128xf32>
    %6 = tpu.matmul %4, %5, %cst_9 {dimension_numbers = #tpu.dot_dimension_numbers<[1], [0], [0], [1], [0, 0, 1, 1], [], []>} : vector<8x128xf32>, vector<128x128xf32>, vector<8x128xf32> -> vector<8x128xf32>
    %c0_10 = arith.constant 0 : index
    %c0_11 = arith.constant 0 : index
    %7 = vector.load %arg3[%c0_10, %c0_11] : memref<1x128xf32, #tpu.memory_space<vmem>>, vector<1x128xf32>
    %8 = vector.broadcast %7 : vector<1x128xf32> to vector<8x128xf32>
    %9 = arith.addf %6, %8 : vector<8x128xf32>
    %cst_12 = arith.constant 0.000000e+00 : f32
    %10 = vector.broadcast %cst_12 : f32 to vector<8x128xf32>
    %11 = arith.maximumf %9, %10 : vector<8x128xf32>
    %c0_13 = arith.constant 0 : index
    %c0_14 = arith.constant 0 : index
    %12 = vector.load %arg4[%c0_13, %c0_14] : memref<128x128xf32, #tpu.memory_space<vmem>>, vector<128x128xf32>
    %cst_15 = arith.constant dense<0.000000e+00> : vector<8x128xf32>
    %13 = tpu.matmul %11, %12, %cst_15 {dimension_numbers = #tpu.dot_dimension_numbers<[1], [0], [0], [1], [0, 0, 1, 1], [], []>} : vector<8x128xf32>, vector<128x128xf32>, vector<8x128xf32> -> vector<8x128xf32>
    %c0_16 = arith.constant 0 : index
    %c0_17 = arith.constant 0 : index
    %14 = vector.load %arg5[%c0_16, %c0_17] : memref<1x128xf32, #tpu.memory_space<vmem>>, vector<1x128xf32>
    %15 = vector.broadcast %14 : vector<1x128xf32> to vector<8x128xf32>
    %16 = arith.addf %13, %15 : vector<8x128xf32>
    %cst_18 = arith.constant 0.000000e+00 : f32
    %17 = vector.broadcast %cst_18 : f32 to vector<8x128xf32>
    %18 = arith.maximumf %16, %17 : vector<8x128xf32>
    %c0_19 = arith.constant 0 : index
    %c0_20 = arith.constant 0 : index
    %19 = vector.load %arg6[%c0_19, %c0_20] : memref<128x128xf32, #tpu.memory_space<vmem>>, vector<128x128xf32>
    %cst_21 = arith.constant dense<0.000000e+00> : vector<8x128xf32>
    %20 = tpu.matmul %18, %19, %cst_21 {dimension_numbers = #tpu.dot_dimension_numbers<[1], [0], [0], [1], [0, 0, 1, 1], [], []>} : vector<8x128xf32>, vector<128x128xf32>, vector<8x128xf32> -> vector<8x128xf32>
    %c0_22 = arith.constant 0 : index
    %c0_23 = arith.constant 0 : index
    %21 = vector.load %arg7[%c0_22, %c0_23] : memref<1x128xf32, #tpu.memory_space<vmem>>, vector<1x128xf32>
    %22 = vector.broadcast %21 : vector<1x128xf32> to vector<8x128xf32>
    %23 = arith.addf %20, %22 : vector<8x128xf32>
    %24 = vector.extract_strided_slice %23 {offsets = [0, 0], sizes = [8, 8], strides = [1, 1]} : vector<8x128xf32> to vector<8x8xf32>
    %c0_24 = arith.constant 0 : index
    %c0_25 = arith.constant 0 : index
    %25 = vector.load %arg8[%c0_24, %c0_25] : memref<8x8xf32, #tpu.memory_space<vmem>>, vector<8x8xf32>
    tpu.vector_store %arg8[%c0_24, %c0_25], %24 {strides = array<i32>} : memref<8x8xf32, #tpu.memory_space<vmem>>, vector<8x8xf32>,
    return
  }
  func.func @transform_0(%arg0: i32) -> (i32, i32) {
    %c0_i32 = arith.constant 0 : i32
    %c0_i32_0 = arith.constant 0 : i32
    return %arg0, %c0_i32 : i32, i32
  }
  func.func @transform_1(%arg0: i32) -> (i32, i32) {
    %c0_i32 = arith.constant 0 : i32
    %c0_i32_0 = arith.constant 0 : i32
    %c0_i32_1 = arith.constant 0 : i32
    return %c0_i32, %c0_i32_0 : i32, i32
  }
  func.func @transform_2(%arg0: i32) -> (i32, i32) {
    %c0_i32 = arith.constant 0 : i32
    %c0_i32_0 = arith.constant 0 : i32
    %c0_i32_1 = arith.constant 0 : i32
    return %c0_i32, %c0_i32_0 : i32, i32
  }
  func.func @transform_3(%arg0: i32) -> (i32, i32) {
    %c0_i32 = arith.constant 0 : i32
    %c0_i32_0 = arith.constant 0 : i32
    %c0_i32_1 = arith.constant 0 : i32
    return %c0_i32, %c0_i32_0 : i32, i32
  }
  func.func @transform_4(%arg0: i32) -> (i32, i32) {
    %c0_i32 = arith.constant 0 : i32
    %c0_i32_0 = arith.constant 0 : i32
    %c0_i32_1 = arith.constant 0 : i32
    return %c0_i32, %c0_i32_0 : i32, i32
  }
  func.func @transform_5(%arg0: i32) -> (i32, i32) {
    %c0_i32 = arith.constant 0 : i32
    %c0_i32_0 = arith.constant 0 : i32
    %c0_i32_1 = arith.constant 0 : i32
    return %c0_i32, %c0_i32_0 : i32, i32
  }
  func.func @transform_6(%arg0: i32) -> (i32, i32) {
    %c0_i32 = arith.constant 0 : i32
    %c0_i32_0 = arith.constant 0 : i32
    %c0_i32_1 = arith.constant 0 : i32
    return %c0_i32, %c0_i32_0 : i32, i32
  }
  func.func @transform_7(%arg0: i32) -> (i32, i32) {
    %c0_i32 = arith.constant 0 : i32
    %c0_i32_0 = arith.constant 0 : i32
    return %arg0, %c0_i32 : i32, i32
  }
}

</mosaic_0001>

<bundles_post_ra>
// kernel: hand_gesture_forward.1
= control target key start
LH: loop header
LB: loop body
LE: loop exit
PB: predicated region body
PF: predicated region fallthrough
CT: control target
= control target key end

     0   :  { %v513_v1 = vmov 0.0   ;;  %vm514_vm0 = vmmov 0   ;;  %vm29_vm1 = vcmask 515072   ;;  %s770_s0 = inlined_call_operand.vmem [shape: f32[8,63], index: 0, kind: input, shape index: {}]   ;;  %s771_s1 = inlined_call_operand.vmem [shape: f32[128,128], index: 1, kind: input, shape index: {}]   ;;  %s772_s2 = inlined_call_operand.vmem [shape: f32[1,128], index: 2, kind: input, shape index: {}]   ;;  %s773_s3 = inlined_call_operand.vmem [shape: f32[128,128], index: 3, kind: input, shape index: {}]   ;;  %s774_s4 = inlined_call_operand.vmem [shape: f32[1,128], index: 4, kind: input, shape index: {}]   ;;  %s775_s5 = inlined_call_operand.vmem [shape: f32[128,128], index: 5, kind: input, shape index: {}]   ;;  %s776_s6 = inlined_call_operand.vmem [shape: f32[1,128], index: 6, kind: input, shape index: {}]   ;;  %s777_s7 = inlined_call_operand.hbm [shape: f32[8,8], index: 7, kind: output, shape index: {}]  }
   0x1   :  { %v47_v0 = vld [vmem:[%s771_s1 + $0x78] sm:$0xff]  ;;  %383 = vmatprep.subr.mxu0 %v513_v1  ;;  %27 = vst [vmem:[#allocation2] sm:$0xff] %v513_v1  ;;  %v46_v2 = vld [vmem:[%s771_s1 + $0x70] sm:$0xff]  ;;  %415 = vmatprep.mubr.msk.f32.mxu0 %vm514_vm0, %v513_v1  ;;  %v45_v3 = vld [vmem:[%s771_s1 + $0x68] sm:$0xff] }
   0x2   :  { %384 = vmatpush3.msra.mxu0 %v47_v0  ;;  %418 = vmatprep.subr.mxu1 %v513_v1  ;;  %v44_v4 = vld [vmem:[%s771_s1 + $0x60] sm:$0xff]  ;;  %v141_v6 = vld [vmem:[%s773_s3 + $0x78] sm:$0xff]  ;;  %v140_v7 = vld [vmem:[%s773_s3 + $0x70] sm:$0xff] }
   0x3   :  { %385 = vmatprep.subr.mxu0 %v513_v1  ;;  %450 = vmatprep.mubr.msk.f32.mxu1 %vm514_vm0, %v513_v1  ;;  %v28_v5 = vld [vmem:[%s770_s0] sm:$0xff]  ;;  %v43_v8 = vld [vmem:[%s771_s1 + $0x58] sm:$0xff]  ;;  %v139_v9 = vld [vmem:[%s773_s3 + $0x68] sm:$0xff] }
   0x4   :  { %386 = vmatpush3.msra.mxu0 %v46_v2  ;;  %30 = vst.msk [vmem:[#allocation2] sm:$0xff] %vm29_vm1, %v28_v5  ;;  %419 = vmatpush3.msra.mxu1 %v141_v6  ;;  %v42_v10 = vld [vmem:[%s771_s1 + $0x50] sm:$0xff]  ;;  %v138_v11 = vld [vmem:[%s773_s3 + $0x60] sm:$0xff] }
   0x5   :  { %387 = vmatprep.subr.mxu0 %v513_v1  ;;  %420 = vmatprep.subr.mxu1 %v513_v1 }
   0x6   :  { %388 = vmatpush3.msra.mxu0 %v45_v3  ;;  %421 = vmatpush3.msra.mxu1 %v140_v7 }
   0x7   :  { %389 = vmatprep.subr.mxu0 %v513_v1  ;;  %422 = vmatprep.subr.mxu1 %v513_v1 }
   0x8   :  { %390 = vmatpush3.msra.mxu0 %v44_v4  ;;  %423 = vmatpush3.msra.mxu1 %v139_v9 }
   0x9   :  { %391 = vmatprep.subr.mxu0 %v513_v1 }
   0xa   :  { %392 = vmatpush3.msra.mxu0 %v43_v8 }
   0xb   :  { %12 = vsyncpa [#allocation4], 0  ;;  %393 = vmatprep.subr.mxu0 %v513_v1  ;;  %v41_v12 = vld [vmem:[%s771_s1 + $0x48] sm:$0xff]  ;;  %424 = vmatprep.subr.mxu1 %v513_v1  ;;  %v137_v13 = vld [vmem:[%s773_s3 + $0x58] sm:$0xff]  ;;  %s515_s27 = smov [#allocation3]   ;;  %vm313_vm2 = vcmask 64512  }
   0xc   :  { %394 = vmatpush3.msra.mxu0 %v42_v10  ;;  %425 = vmatpush3.msra.mxu1 %v138_v11  ;;  %v40_v14 = vld [vmem:[%s771_s1 + $0x40] sm:$0xff]  ;;  %v136_v15 = vld [vmem:[%s773_s3 + $0x50] sm:$0xff]  ;;  %v39_v16 = vld [vmem:[%s771_s1 + $0x38] sm:$0xff]  ;;  %s321_s28 = sshll.u32 %s515_s27, 4  ;;  %s322_s28 = int_to_ptr.vmem [resolvable:$true] %s321_s28 }
   0xd   :  { %395 = vmatprep.subr.mxu0 %v513_v1  ;;  %426 = vmatprep.subr.mxu1 %v513_v1  ;;  %v135_v17 = vld [vmem:[%s773_s3 + $0x48] sm:$0xff]  ;;  %v38_v18 = vld [vmem:[%s771_s1 + $0x30] sm:$0xff]  ;;  %v134_v19 = vld [vmem:[%s773_s3 + $0x40] sm:$0xff]  ;;  %p496_p1 = scmp.lt.s32.totalorder %s322_s28, %s322_s28 }
   0xe   :  { %396 = vmatpush3.msra.mxu0 %v41_v12  ;;  %427 = vmatpush3.msra.mxu1 %v137_v13  ;;  %v37_v20 = vld [vmem:[%s771_s1 + $0x28] sm:$0xff]  ;;  %v133_v21 = vld [vmem:[%s773_s3 + $0x38] sm:$0xff]  ;;  %v36_v22 = vld [vmem:[%s771_s1 + $0x20] sm:$0xff] }
   0xf   :  { %397 = vmatprep.subr.mxu0 %v513_v1  ;;  %428 = vmatprep.subr.mxu1 %v513_v1  ;;  %v132_v23 = vld [vmem:[%s773_s3 + $0x30] sm:$0xff]  ;;  %v35_v24 = vld [vmem:[%s771_s1 + $0x18] sm:$0xff]  ;;  %v131_v25 = vld [vmem:[%s773_s3 + $0x28] sm:$0xff] }
  0x10   :  { %398 = vmatpush3.msra.mxu0 %v40_v14  ;;  %429 = vmatpush3.msra.mxu1 %v136_v15  ;;  %v34_v26 = vld [vmem:[%s771_s1 + $0x10] sm:$0xff]  ;;  %v130_v27 = vld [vmem:[%s773_s3 + $0x20] sm:$0xff]  ;;  %v33_v28 = vld [vmem:[%s771_s1 + $0x8] sm:$0xff] }
  0x11   :  { %399 = vmatprep.subr.mxu0 %v513_v1  ;;  %430 = vmatprep.subr.mxu1 %v513_v1  ;;  %v129_v29 = vld [vmem:[%s773_s3 + $0x18] sm:$0xff]  ;;  %v32_v30 = vld [vmem:[%s771_s1] sm:$0xff]  ;;  %v128_v32 = vld [vmem:[%s773_s3 + $0x10] sm:$0xff] }
  0x12   :  { %400 = vmatpush3.msra.mxu0 %v39_v16  ;;  %431 = vmatpush3.msra.mxu1 %v135_v17  ;;  %v31_v31 = vld [vmem:[#allocation2] sm:$0xff]  ;;  %v127_v33 = vld [vmem:[%s773_s3 + $0x8] sm:$0xff]  ;;  %v235_v35 = vld [vmem:[%s775_s5 + $0x78] sm:$0xff] }
  0x13   :  { %401 = vmatprep.subr.mxu0 %v513_v1  ;;  %432 = vmatprep.subr.mxu1 %v513_v1  ;;  %v126_v34 = vld [vmem:[%s773_s3] sm:$0xff]  ;;  %v234_v36 = vld [vmem:[%s775_s5 + $0x70] sm:$0xff]  ;;  %v233_v37 = vld [vmem:[%s775_s5 + $0x68] sm:$0xff] }
  0x14   :  { %402 = vmatpush3.msra.mxu0 %v38_v18  ;;  %433 = vmatpush3.msra.mxu1 %v134_v19  ;;  %v232_v38 = vld [vmem:[%s775_s5 + $0x60] sm:$0xff]  ;;  %v231_v39 = vld [vmem:[%s775_s5 + $0x58] sm:$0xff]  ;;  %v230_v40 = vld [vmem:[%s775_s5 + $0x50] sm:$0xff] }
  0x15   :  { %403 = vmatprep.subr.mxu0 %v513_v1  ;;  %434 = vmatprep.subr.mxu1 %v513_v1  ;;  %v229_v41 = vld [vmem:[%s775_s5 + $0x48] sm:$0xff]  ;;  %v228_v42 = vld [vmem:[%s775_s5 + $0x40] sm:$0xff]  ;;  %v227_v43 = vld [vmem:[%s775_s5 + $0x38] sm:$0xff] }
  0x16   :  { %404 = vmatpush3.msra.mxu0 %v37_v20  ;;  %435 = vmatpush3.msra.mxu1 %v133_v21  ;;  %v226_v44 = vld [vmem:[%s775_s5 + $0x30] sm:$0xff]  ;;  %v225_v45 = vld [vmem:[%s775_s5 + $0x28] sm:$0xff]  ;;  %v224_v46 = vld [vmem:[%s775_s5 + $0x20] sm:$0xff] }
  0x17   :  { %405 = vmatprep.subr.mxu0 %v513_v1  ;;  %436 = vmatprep.subr.mxu1 %v513_v1  ;;  %v223_v47 = vld [vmem:[%s775_s5 + $0x18] sm:$0xff]  ;;  %v329_v48 = vld [vmem:[%s772_s2] ss:$0 sm:$0xff]  ;;  %v222_v53 = vld [vmem:[%s775_s5 + $0x10] sm:$0xff] }
  0x18   :  { %406 = vmatpush3.msra.mxu0 %v36_v22  ;;  %437 = vmatpush3.msra.mxu1 %v132_v23  ;;  %v221_v54 = vld [vmem:[%s775_s5 + $0x8] sm:$0xff]  ;;  %v220_v55 = vld [vmem:[%s775_s5] sm:$0xff]  ;;  %s491_s5 = scalar_lea.vmem %s322_s28, 128 }
  0x19   :  { %407 = vmatprep.subr.mxu0 %v513_v1  ;;  %438 = vmatprep.subr.mxu1 %v513_v1  ;;  %v330_v56 = vld [vmem:[%s774_s4] ss:$0 sm:$0xff]  ;;  %p492_p0 = scmp.ne.s32.totalorder %s322_s28, %s491_s5  ;;  %p497_p2 = scmp.lt.s32.totalorder %s491_s5, %s491_s5 }
  0x1a   :  { %408 = vmatpush3.msra.mxu0 %v35_v24  ;;  %439 = vmatpush3.msra.mxu1 %v131_v25  ;;  %v331_v61 = vld [vmem:[%s776_s6] ss:$0 sm:$0xff] }
  0x1b   :  { %409 = vmatprep.subr.mxu0 %v513_v1  ;;  %440 = vmatprep.subr.mxu1 %v513_v1  ;;  %p498_p3 = por %p497_p2, %p496_p1 }
  0x1c   :  { %410 = vmatpush3.msra.mxu0 %v34_v26  ;;  %441 = vmatpush3.msra.mxu1 %v130_v27 }
  0x1d   :  { %411 = vmatprep.subr.mxu0 %v513_v1  ;;  %442 = vmatprep.subr.mxu1 %v513_v1  ;;  %p499_p4 = pnand %p498_p3, %p492_p0 }
  0x1e   :  { %412 = vmatpush3.msra.mxu0 %v33_v28  ;;  %443 = vmatpush3.msra.mxu1 %v129_v29 }
  0x1f   :  { %413 = vmatprep.subr.mxu0 %v513_v1  ;;  %444 = vmatprep.subr.mxu1 %v513_v1 }
  0x20   :  { %414 = vmatpush3.msra.mxu0 %v32_v30  ;;  %445 = vmatpush3.msra.mxu1 %v128_v32 }
  0x21   :  { %416 = vmatmul.mubr.f32.vlgmr.msra.gmra.mxu0 %v31_v31  ;;  %453 = vmatprep.subr.mxu0 %v513_v1 }
  0x22   :  { %485 = vmatprep.mubr.msk.f32.mxu0 %vm514_vm0, %v513_v1  ;;  %446 = vmatprep.subr.mxu1 %v513_v1 }
  0x23   :  { %447 = vmatpush3.msra.mxu1 %v127_v33  ;;  %454 = vmatpush3.msra.mxu0 %v235_v35 }
  0x24   :  { %448 = vmatprep.subr.mxu1 %v513_v1  ;;  %455 = vmatprep.subr.mxu0 %v513_v1 }
  0x25   :  { %449 = vmatpush3.msra.mxu1 %v126_v34  ;;  %456 = vmatpush3.msra.mxu0 %v234_v36 }
  0x26   :  { %457 = vmatprep.subr.mxu0 %v513_v1 }
  0x27   :  { %458 = vmatpush3.msra.mxu0 %v233_v37 }
  0x28   :  { %459 = vmatprep.subr.mxu0 %v513_v1 }
  0x29   :  { %460 = vmatpush3.msra.mxu0 %v232_v38 }
  0x2a   :  { %461 = vmatprep.subr.mxu0 %v513_v1 }
  0x2b   :  { %462 = vmatpush3.msra.mxu0 %v231_v39 }
  0x2c   :  { %463 = vmatprep.subr.mxu0 %v513_v1 }
  0x2d   :  { %464 = vmatpush3.msra.mxu0 %v230_v40 }
  0x2e   :  { %465 = vmatprep.subr.mxu0 %v513_v1 }
  0x2f   :  { %466 = vmatpush3.msra.mxu0 %v229_v41 }
  0x30   :  { %467 = vmatprep.subr.mxu0 %v513_v1 }
  0x31   :  { %468 = vmatpush3.msra.mxu0 %v228_v42 }
  0x32   :  { %469 = vmatprep.subr.mxu0 %v513_v1 }
  0x33   :  { %470 = vmatpush3.msra.mxu0 %v227_v43 }
  0x34   :  { %471 = vmatprep.subr.mxu0 %v513_v1 }
  0x35   :  { %472 = vmatpush3.msra.mxu0 %v226_v44 }
  0x36   :  { %473 = vmatprep.subr.mxu0 %v513_v1 }
  0x37   :  { %474 = vmatpush3.msra.mxu0 %v225_v45 }
  0x38   :  { %475 = vmatprep.subr.mxu0 %v513_v1 }
  0x39   :  { %476 = vmatpush3.msra.mxu0 %v224_v46 }
  0x3a   :  { %477 = vmatprep.subr.mxu0 %v513_v1 }
  0x3b   :  { %478 = vmatpush3.msra.mxu0 %v223_v47 }
  0x3c   :  { %479 = vmatprep.subr.mxu0 %v513_v1 }
  0x3d   :  { %480 = vmatpush3.msra.mxu0 %v222_v53 }
  0x3e   :  { %481 = vmatprep.subr.mxu0 %v513_v1 }
  0x3f   :  { %482 = vmatpush3.msra.mxu0 %v221_v54 }
  0x40   :  { %483 = vmatprep.subr.mxu0 %v513_v1 }
  0x41   :  { %484 = vmatpush3.msra.mxu0 %v220_v55 }
  0xe1   :  { %v121_v49 = vpop.f32.mrf.mxu0 }
  0xe2   :  { %v122_v50 = vadd.f32 %v329_v48, %v121_v49 }
  0xe3   :  { %v417_v51 = vpop.f32.mrf.mxu0 }
  0xe4   :  { %v125_v52 = vmax.f32 %v122_v50, 0.0 }
  0xe6   :  { %451 = vmatmul.mubr.f32.vlgmr.msra.gmra.mxu1 %v125_v52 }
 0x1a6   :  { %v215_v57 = vpop.f32.mrf.mxu1 }
 0x1a7   :  { %v216_v58 = vadd.f32 %v330_v56, %v215_v57 }
 0x1a8   :  { %v452_v59 = vpop.f32.mrf.mxu1 }
 0x1a9   :  { %v219_v60 = vmax.f32 %v216_v58, 0.0 }
 0x1ab   :  { %486 = vmatmul.mubr.f32.vlgmr.msra.gmra.mxu0 %v219_v60 }
 0x26b   :  { %v309_v62 = vpop.f32.mrf.mxu0 }
 0x26c   :  { %v310_v63 = vadd.f32 %v331_v61, %v309_v62 }
 0x26d   :  { %v487_v0 = vpop.f32.mrf.mxu0 }
 0x26e   :  { %314 = vst.msk [vmem:[#allocation3] sm:$0xff] %vm313_vm2, %v310_v63 }
 0x26f   :  { %502 = shalt.err (!%p499_p4)
}
 0x270   :  { %324 = dma.vmem_to_hbm [thread:$0]  %s322_s28, 128, %s777_s7, [#allocation4]  }
 0x271   :  { %511 = dma.done.wait [#allocation4], 128  }
 0x272   :  { %512 = vsyncadd [#allocation4], 4294967168 }
 0x273   :  { %328 = vsyncpa [#allocation4], 1 }

</bundles_post_ra>
